<compile_context>
chip_gen: v6e
topology: v6e:2x2x1
jax: 0.10.0
libtpu: 0.0.40
codegen_flags: <defaults>
</compile_context>

<pallas_src>
import math

import numpy as np
import jax
import jax.numpy as jnp
from jax.experimental import pallas as pl
from jax.experimental.pallas import tpu as pltpu


# ----------------------------------------------------------------------------
# Host-side parameter construction (deterministic, mirrors the torch __init__)
# ----------------------------------------------------------------------------
def get_freq_indices(method):
    assert method in ['top1', 'top2', 'top4', 'top8', 'top16', 'top32',
                      'bot1', 'bot2', 'bot4', 'bot8', 'bot16', 'bot32',
                      'low1', 'low2', 'low4', 'low8', 'low16', 'low32']
    num_freq = int(method[3:])
    if 'top' in method:
        all_x = [0, 0, 6, 0, 0, 1, 1, 4, 5, 1, 3, 0, 0, 0, 3, 2,
                 4, 6, 3, 5, 5, 2, 6, 5, 5, 3, 3, 4, 2, 2, 6, 1]
        all_y = [0, 1, 0, 5, 2, 0, 2, 0, 0, 6, 0, 4, 6, 3, 5, 2,
                 6, 3, 3, 3, 5, 1, 1, 2, 4, 2, 1, 1, 3, 0, 5, 3]
    elif 'low' in method:
        all_x = [0, 0, 1, 1, 0, 2, 2, 1, 2, 0, 3, 4, 0, 1, 3, 0,
                 1, 2, 3, 4, 5, 0, 1, 2, 3, 4, 5, 6, 1, 2, 3, 4]
        all_y = [0, 1, 0, 1, 2, 0, 1, 2, 2, 3, 0, 0, 4, 3, 1, 5,
                 4, 3, 2, 1, 0, 6, 5, 4, 3, 2, 1, 0, 6, 5, 4, 3]
    else:  # bot
        all_x = [6, 1, 3, 3, 2, 4, 1, 2, 4, 4, 5, 1, 4, 6, 2, 5,
                 6, 1, 6, 2, 2, 4, 3, 3, 5, 5, 6, 2, 5, 5, 3, 6]
        all_y = [6, 4, 4, 6, 6, 3, 1, 4, 4, 5, 6, 5, 2, 2, 5, 1,
                 4, 3, 5, 0, 3, 1, 1, 2, 4, 2, 1, 1, 5, 3, 3, 3]
    return all_x[:num_freq], all_y[:num_freq]


def _build_filter(pos, freq, POS):
    result = math.cos(math.pi * freq * (pos + 0.5) / POS) / math.sqrt(POS)
    if freq == 0:
        return result
    return result * math.sqrt(2)


def get_dct_filter(tile_x, tile_y, mapper_x, mapper_y, channel):
    """Returns (channel, tile_x, tile_y) float32 DCT filter bank (numpy)."""
    dct = np.zeros((channel, tile_x, tile_y), dtype=np.float64)
    c_part = channel // len(mapper_x)
    for i, (u_x, v_y) in enumerate(zip(mapper_x, mapper_y)):
        for t_x in range(tile_x):
            for t_y in range(tile_y):
                dct[i * c_part:(i + 1) * c_part, t_x, t_y] = (
                    _build_filter(t_x, u_x, tile_x) * _build_filter(t_y, v_y, tile_y))
    return dct


def _adaptive_pool_matrix(in_size, out_size):
    """(out_size, in_size) matrix reproducing torch AdaptiveAvgPool exactly."""
    P = np.zeros((out_size, in_size), dtype=np.float64)
    for o in range(out_size):
        s = (o * in_size) // out_size
        e = -((-(o + 1) * in_size) // out_size)          # ceil((o+1)*in/out)
        P[o, s:e] = 1.0 / (e - s)
    return P


def build_spectral_weight(dct_np, c, h, w, dct_h, dct_w):
    """Fold adaptive_avg_pool2d into the DCT filter -> (C, H*W) float32 weight.

    y[b,c] = sum_{ph,pw} dct[c,ph,pw] * pooled[b,c,ph,pw]
           = sum_{h,w}   x[b,c,h,w]   * (P_h^T dct[c] P_w)[h,w]
    """
    if (h, w) == (dct_h, dct_w):
        wfull = dct_np
    else:
        ph = _adaptive_pool_matrix(h, dct_h)             # (dct_h, H)
        pw = _adaptive_pool_matrix(w, dct_w)             # (dct_w, W)
        wfull = np.einsum("cuv,uh,vw->chw", dct_np, ph, pw)
    return jnp.asarray(wfull.reshape(c, h * w), dtype=jnp.float32)


# ----------------------------------------------------------------------------
# Pallas kernel
# ----------------------------------------------------------------------------
def _msa_kernel(x_ref, wgt_ref, w1_ref, w2_ref, o_ref):
    # x_ref : (B, C, HW)  full-resolution block
    # wgt   : (C, HW)     pooling-folded DCT weight (resident)
    # w1    : (C, Cr)     fc1.weight.T        w2 : (Cr, C)  fc2.weight.T
    # o_ref : (B, C, HW)  re-weighted full-resolution block
    x = x_ref[...]                                                     # (B, C, HW)

    # spectral (pool+DCT) global pooling over the lane axis -> (B, C)
    y = jnp.sum(x * wgt_ref[...][None, :, :], axis=-1)                 # (B, C)

    # squeeze-excite MLP, batched over B (MXU matmuls; compute hidden under DMA)
    h = jnp.maximum(
        jnp.dot(y, w1_ref[...], preferred_element_type=jnp.float32), 0.0)   # (B, Cr)
    s = jax.nn.sigmoid(
        jnp.dot(h, w2_ref[...], preferred_element_type=jnp.float32))        # (B, C)

    o_ref[...] = x * s[:, :, None]                                     # lane-broadcast


def _pick_batch_block(n, bytes_per_batch):
    """Batch block: target <=4 MiB per x-block; shape grid for >=2 (ideally >=8)
    balanced steps (v7x megacore) unless that drops blocks below ~1 MiB while
    bigger blocks were available."""
    b_blk = max(1, min(n, (4 << 20) // max(bytes_per_batch, 1)))
    knee = 1 << 20
    for steps in (8, 2):
        if n < steps:
            continue
        b_for_steps = -(-n // steps)                     # cdiv
        if (b_for_steps * bytes_per_batch >= knee
                or b_blk * bytes_per_batch < knee):
            b_blk = min(b_blk, b_for_steps)
            break
    return max(1, b_blk)


def multispectral_attention(x_nchw, dct_np, w1, w2, dct_h, dct_w):
    """x_nchw: (N, C, H, W) f32. Returns (N, C, H, W) f32 == torch forward."""
    n, c, h, w = x_nchw.shape
    hw = h * w
    cr = w1.shape[1]

    # NCHW -> (N, C, H*W): contiguous reshape (free); H*W maps to the lane axis.
    x_flat = x_nchw.reshape(n, c, hw).astype(jnp.float32)
    wgt = build_spectral_weight(dct_np, c, h, w, dct_h, dct_w)         # (C, HW)

    bytes_per_batch = c * hw * 4
    b_blk = _pick_batch_block(n, bytes_per_batch)
    grid = (pl.cdiv(n, b_blk),)     # ragged last block OK (leading dim, writes masked)

    # VMEM footprint: 2x(in block) + 2x(out block) <= 16 MiB (4 MiB cap) + small
    # residents (wgt, W1, W2) -> comfortably under 32 MiB scoped on all gens,
    # including v7x's 64 MiB/TC physical.
    out = pl.pallas_call(
        _msa_kernel,
        out_shape=jax.ShapeDtypeStruct((n, c, hw), jnp.float32),
        grid_spec=pltpu.PrefetchScalarGridSpec(
            num_scalar_prefetch=0,
            grid=grid,
            in_specs=[
                pl.BlockSpec((b_blk, c, hw), lambda i: (i, 0, 0)),     # x block
                pl.BlockSpec((c, hw), lambda i: (0, 0)),               # fused dct weight
                pl.BlockSpec((c, cr), lambda i: (0, 0)),               # fc1.weight.T
                pl.BlockSpec((cr, c), lambda i: (0, 0)),               # fc2.weight.T
            ],
            out_specs=pl.BlockSpec((b_blk, c, hw), lambda i: (i, 0, 0)),
        ),
        compiler_params=pltpu.CompilerParams(
            dimension_semantics=("parallel",),
            vmem_limit_bytes=32 * 1024 * 1024,
        ),
    )(x_flat, wgt, w1, w2)

    return out.reshape(n, c, h, w)
    # TODO(synk): optional bf16 I/O (halves HBM bytes) if the model tolerates it.


# ----------------------------------------------------------------------------
# Reference (plain JAX) for verification
# ----------------------------------------------------------------------------
def reference(x_nchw, dct_np, w1, w2, dct_h, dct_w):
    n, c, h, w = x_nchw.shape
    dct = jnp.asarray(dct_np, dtype=jnp.float32)
    x_pooled = x_nchw
    if (h, w) != (dct_h, dct_w):
        x_pooled = x_nchw.reshape(
            n, c, dct_h, h // dct_h, dct_w, w // dct_w).mean(axis=(3, 5))
    y = jnp.sum(x_pooled * dct[None], axis=(2, 3))                     # (n, c)
    hdn = jnp.maximum(y @ w1, 0.0)
    s = jax.nn.sigmoid(hdn @ w2)                                       # (n, c)
    return x_nchw * s[:, :, None, None]


# ----------------------------------------------------------------------------
if __name__ == "__main__":
    # Module config consistent with the torch constraints:
    # channel % num_freq == 0, channel // reduction >= 1.
    channel = 32
    dct_h = dct_w = 16
    reduction = 4
    freq_sel_method = "top16"

    N, C, H, W = 2, channel, 16, 16

    mx, my = get_freq_indices(freq_sel_method)
    mx = [t * (dct_h // 7) for t in mx]
    my = [t * (dct_w // 7) for t in my]
    dct_np = get_dct_filter(dct_h, dct_w, mx, my, channel)             # (C, dct_h, dct_w)

    key = jax.random.PRNGKey(0)
    kx, k1, k2, kx2 = jax.random.split(key, 4)
    x = jax.random.normal(kx, (N, C, H, W), dtype=jnp.float32)

    cr = channel // reduction
    # torch Linear weights are (out, in), bias=False; stored pre-transposed.
    bound1 = 1.0 / math.sqrt(channel)
    bound2 = 1.0 / math.sqrt(cr)
    w1 = jax.random.uniform(k1, (channel, cr), jnp.float32, -bound1, bound1)  # fc1.weight.T
    w2 = jax.random.uniform(k2, (cr, channel), jnp.float32, -bound2, bound2)  # fc2.weight.T

    # Path 1: spatial size == DCT tile size.
    out = multispectral_attention(x, dct_np, w1, w2, dct_h, dct_w)
    out = jax.block_until_ready(out)
    ref = reference(x, dct_np, w1, w2, dct_h, dct_w)
    assert out.shape == (N, C, H, W)
    assert jnp.allclose(out, ref, atol=2e-5, rtol=1e-5), "mismatch vs reference"

    # Path 2: larger spatial size -> adaptive pooling folded into the kernel weight.
    x_big = jax.random.normal(kx2, (N, C, 32, 32), dtype=jnp.float32)
    out_big = multispectral_attention(x_big, dct_np, w1, w2, dct_h, dct_w)
    out_big = jax.block_until_ready(out_big)
    ref_big = reference(x_big, dct_np, w1, w2, dct_h, dct_w)
    assert out_big.shape == (N, C, 32, 32)
    assert jnp.allclose(out_big, ref_big, atol=2e-5, rtol=1e-5), "mismatch (pooled path)"

    print("KERNEL_OK")
</pallas_src>

<mosaic_0001>
module attributes {stable_mosaic.version = 11 : i64} {
  func.func @_msa_kernel(%arg0: i32, %arg1: memref<1x32x256xf32, #tpu.memory_space<vmem>>, %arg2: memref<32x256xf32, #tpu.memory_space<vmem>>, %arg3: memref<32x8xf32, #tpu.memory_space<vmem>>, %arg4: memref<8x32xf32, #tpu.memory_space<vmem>>, %arg5: memref<1x32x256xf32, #tpu.memory_space<vmem>>) attributes {dimension_semantics = [#tpu.dimension_semantics<parallel>], iteration_bounds = array<i64: 2>, scalar_prefetch = 0 : i64, scratch_operands = 0 : i64, tpu.core_type = #tpu.core_type<tc>, window_params = [{transform_indices = @transform_0, window_bounds = array<i64: 1, 32, 256>}, {pipeline_mode = #tpu.pipeline_mode<synchronous>, transform_indices = @transform_1, window_bounds = array<i64: 32, 256>}, {pipeline_mode = #tpu.pipeline_mode<synchronous>, transform_indices = @transform_2, window_bounds = array<i64: 32, 8>}, {pipeline_mode = #tpu.pipeline_mode<synchronous>, transform_indices = @transform_3, window_bounds = array<i64: 8, 32>}, {transform_indices = @transform_4, window_bounds = array<i64: 1, 32, 256>}]} {
    %c0 = arith.constant 0 : index
    %c0_0 = arith.constant 0 : index
    %c0_1 = arith.constant 0 : index
    %0 = vector.load %arg1[%c0, %c0_0, %c0_1] : memref<1x32x256xf32, #tpu.memory_space<vmem>>, vector<1x32x256xf32>
    %c0_2 = arith.constant 0 : index
    %c0_3 = arith.constant 0 : index
    %1 = vector.load %arg2[%c0_2, %c0_3] : memref<32x256xf32, #tpu.memory_space<vmem>>, vector<32x256xf32>
    %2 = vector.shape_cast %1 : vector<32x256xf32> to vector<1x32x256xf32>
    %3 = arith.mulf %0, %2 : vector<1x32x256xf32>
    %cst = arith.constant dense<0.000000e+00> : vector<1x32xf32>
    %4 = vector.multi_reduction <add>, %3, %cst [2] : vector<1x32x256xf32> to vector<1x32xf32>
    %c0_4 = arith.constant 0 : index
    %c0_5 = arith.constant 0 : index
    %5 = vector.load %arg3[%c0_4, %c0_5] : memref<32x8xf32, #tpu.memory_space<vmem>>, vector<32x8xf32>
    %cst_6 = arith.constant dense<0.000000e+00> : vector<1x8xf32>
    %6 = tpu.matmul %4, %5, %cst_6 {dimension_numbers = #tpu.dot_dimension_numbers<[1], [0], [0], [1], [0, 0, 1, 1], [], []>} : vector<1x32xf32>, vector<32x8xf32>, vector<1x8xf32> -> vector<1x8xf32>
    %cst_7 = arith.constant 0.000000e+00 : f32
    %7 = vector.broadcast %cst_7 : f32 to vector<1x8xf32>
    %8 = arith.maximumf %6, %7 : vector<1x8xf32>
    %c0_8 = arith.constant 0 : index
    %c0_9 = arith.constant 0 : index
    %9 = vector.load %arg4[%c0_8, %c0_9] : memref<8x32xf32, #tpu.memory_space<vmem>>, vector<8x32xf32>
    %cst_10 = arith.constant dense<0.000000e+00> : vector<1x32xf32>
    %10 = tpu.matmul %8, %9, %cst_10 {dimension_numbers = #tpu.dot_dimension_numbers<[1], [0], [0], [1], [0, 0, 1, 1], [], []>} : vector<1x8xf32>, vector<8x32xf32>, vector<1x32xf32> -> vector<1x32xf32>
    %11 = arith.negf %10 : vector<1x32xf32>
    %12 = math.exp %11 : vector<1x32xf32>
    %cst_11 = arith.constant 1.000000e+00 : f32
    %13 = vector.broadcast %cst_11 : f32 to vector<1x32xf32>
    %14 = arith.addf %13, %12 : vector<1x32xf32>
    %15 = arith.divf %13, %14 : vector<1x32xf32>
    %16 = vector.shape_cast %15 : vector<1x32xf32> to vector<1x32x1xf32>
    %17 = vector.broadcast %16 : vector<1x32x1xf32> to vector<1x32x256xf32>
    %18 = arith.mulf %0, %17 : vector<1x32x256xf32>
    %c0_12 = arith.constant 0 : index
    %c0_13 = arith.constant 0 : index
    %c0_14 = arith.constant 0 : index
    %19 = vector.load %arg5[%c0_12, %c0_13, %c0_14] : memref<1x32x256xf32, #tpu.memory_space<vmem>>, vector<1x32x256xf32>
    tpu.vector_store %arg5[%c0_12, %c0_13, %c0_14], %18 {strides = array<i32>} : memref<1x32x256xf32, #tpu.memory_space<vmem>>, vector<1x32x256xf32>,
    return
  }
  func.func @transform_0(%arg0: i32) -> (i32, i32, i32) {
    %c0_i32 = arith.constant 0 : i32
    %c0_i32_0 = arith.constant 0 : i32
    %c0_i32_1 = arith.constant 0 : i32
    return %arg0, %c0_i32, %c0_i32_0 : i32, i32, i32
  }
  func.func @transform_1(%arg0: i32) -> (i32, i32) {
    %c0_i32 = arith.constant 0 : i32
    %c0_i32_0 = arith.constant 0 : i32
    %c0_i32_1 = arith.constant 0 : i32
    return %c0_i32, %c0_i32_0 : i32, i32
  }
  func.func @transform_2(%arg0: i32) -> (i32, i32) {
    %c0_i32 = arith.constant 0 : i32
    %c0_i32_0 = arith.constant 0 : i32
    %c0_i32_1 = arith.constant 0 : i32
    return %c0_i32, %c0_i32_0 : i32, i32
  }
  func.func @transform_3(%arg0: i32) -> (i32, i32) {
    %c0_i32 = arith.constant 0 : i32
    %c0_i32_0 = arith.constant 0 : i32
    %c0_i32_1 = arith.constant 0 : i32
    return %c0_i32, %c0_i32_0 : i32, i32
  }
  func.func @transform_4(%arg0: i32) -> (i32, i32, i32) {
    %c0_i32 = arith.constant 0 : i32
    %c0_i32_0 = arith.constant 0 : i32
    %c0_i32_1 = arith.constant 0 : i32
    return %arg0, %c0_i32, %c0_i32_0 : i32, i32, i32
  }
}

</mosaic_0001>

<bundles_post_ra>
// kernel: tpu_custom_call.1
= control target key start
LH: loop header
LB: loop body
LE: loop exit
PB: predicated region body
PF: predicated region fallthrough
CT: control target
= control target key end

     0   :  { %9 = vsyncpa [#allocation3], 0  ;;  %s1092_s0 = inlined_call_operand.hbm [shape: f32[2,32,256], index: 0, kind: input, shape index: {}]   ;;  %s1093_s1 = inlined_call_operand.hbm [shape: f32[32,256], index: 1, kind: input, shape index: {}]   ;;  %s1094_s2 = inlined_call_operand.vmem [shape: f32[32,8], index: 2, kind: input, shape index: {}]   ;;  %s1095_s3 = inlined_call_operand.vmem [shape: f32[8,32], index: 3, kind: input, shape index: {}]   ;;  %s1096_s4 = inlined_call_operand.hbm [shape: f32[2,32,256], index: 4, kind: output, shape index: {}]  }
   0x1   :  { %11 = vsyncpa [#allocation3 + $0x1], 0 }
   0x2   :  { %12 = vsyncpa [#allocation6], 0 }
   0x3   :  { %13 = vsyncpa [#allocation4], 0 }
   0x4   :  { %15 = vsyncpa [#allocation4 + $0x1], 0  ;;  %s858_s15 = smov 0   ;;  %s860_s16 = smov 0  }
   0x5   :  { %s862_s17 = smov 0   ;;  %s864_s18 = smov 0  }
   0x6 LB: > { %s879_s19 = sadd.s32 4294967295, %s822_s18   ;;  %s589_s20 = sadd.s32 4294967294, %s822_s18   ;;  %s822_s18 = sphi %s864_s18, %s1118_s18   ;;  %s818_s17 = sphi %s862_s17, %s1117_s17   ;;  %s814_s16 = sphi %s860_s16, %s1116_s16   ;;  %s810_s15 = sphi %s858_s15, %s1115_s15  }
   0x7   : > { %p41_p0 = scmp.ne.s32.totalorder %s814_s16, %s810_s15  ;;  %p1097_p1 = scmp.eq.s32.totalorder %s879_s19, 0 }
   0x8   : > { %p134_p3 = scmp.eq.s32.totalorder %s589_s20, 1  ;;  %p590_p5 = scmp.ge.s32.totalorder %s822_s18, 1 }
   0x9   : > { %p888_p4 = por %p1097_p1, %p41_p0  ;;  %p141_p7 = scmp.lt.s32.totalorder %s822_s18, 3 }
   0xa   : > { %p893_p6 = por %p134_p3, %p41_p0  ;;  %s824_s24 = smov [#allocation5]  }
   0xb   : > { %s1101_s21 = scalar_select %p888_p4, 1, 0 }
   0xc   : > { %s1102_s22 = scalar_select %p893_p6, 1, 0 }
   0xd   : > { %p898_p8 = pnand %p590_p5, %p141_p7  ;;  %s153_s25 = sshll.u32 %s824_s24, 4  ;;  %s154_s25 = int_to_ptr.vmem [resolvable:$true] %s153_s25 }
   0xe   : > { %s912_s27 = sadd.s32 1, %s822_s18   ;;  %s28_s28 = sadd.s32 1, %s818_s17 }
   0xf   : > { %s1103_s23 = scalar_select %p898_p8, 1, 0 }
  0x10   : > { %p641_p9 = pneg %p898_p8  ;;  %s25_s29 = ssub.s32 %s822_s18, %s912_s27 }
  0x11   : > { %s711_s30 = scalar_lea.vmem %s154_s25, 1024  ;;  %p719_p5 = scmp.lt.s32.totalorder %s154_s25, %s154_s25 }
  0x12   : > { %p907_p11 = pnand %p641_p9, %p1097_p1  ;;  %p712_p13 = scmp.ne.s32.totalorder %s154_s25, %s711_s30 }
  0x13   : > { %p720_p7 = scmp.lt.s32.totalorder %s711_s30, %s711_s30 }
  0x14   : > { %p702_p12 = pneg %p907_p11 }
  0x15   : > { %p721_p10 = por %p720_p7, %p719_p5 }
  0x16   : > { %p714_p0 = pnand %p712_p13, %p702_p12 }
  0x18   : > { %p715_p3 = pneg %p714_p0 }
  0x1a   : > { %p722_p2 = pnand %p721_p10, %p715_p3 }
  0x1c   : > { %725 = shalt.err (!%p722_p2)
}
  0x1d   : > { %s825_s5 = smov 256   ;;  %s826_s6 = smov 16  }
  0x1e   : > { %644 = dma.hbm_to_vmem [thread:$0]  (!%p907_p11), %s1093_s1, 1024, %s154_s25, [#allocation6], %s825_s5, %s825_s5, %s826_s6  }
  0x1f   : > { %p26_p2 = scmp.eq.s32.totalorder %s25_s29, 0  ;;  %p35_p9 = scmp.ne.s32.totalorder %s818_s17, %s814_s16 }
  0x20   : > { %p36_p10 = scmp.eq.s32.totalorder %s822_s18, 0  ;;  %p654_p12 = scmp.lt.s32.totalorder %s822_s18, 2 }
  0x21   : > { %s932_s9 = scalar_select %p26_p2, %s818_s17, %s28_s28  }
  0x22   : > { %p37_p13 = por %p36_p10, %p35_p9  ;;  %p1105_p0 = scmp.eq.s32.totalorder %s879_s19, 1 }
  0x23   : > { %s173_s11 = sand.u32 1, %s818_s17   ;;  %s608_s12 = sshll.u32 %s822_s18, 10 }
  0x24   : > { %p936_p3 = por %p1105_p0, %p35_p9  ;;  %s593_s13 = sshll.u32 %s173_s11, 6 }
  0x25   : > { %s945_s24 = scalar_lea.hbm %s1092_s0, %s608_s12  ;;  %s177_s25 = scalar_lea.vmem [#allocation2], %s593_s13 }
  0x26   : > { %s1106_s10 = scalar_select %p936_p3, 1, 0 }
  0x27   : > { %s184_s26 = sshll.u32 %s177_s25, 4  ;;  %p947_p11 = pnand %p654_p12, %p37_p13  ;;  %s951_s26 = int_to_ptr.vmem [resolvable:$true] %s184_s26 }
  0x28   : > { %s953_s29 = scalar_lea.sflag [#allocation3], %s173_s11  ;;  %s726_s30 = scalar_lea.hbm %s945_s24, 1024 }
  0x29   : > { %p727_p5 = scmp.ne.s32.totalorder %s945_s24, %s726_s30  ;;  %p728_p7 = pneg %p947_p11 }
  0x2a   : > { %s731_s12 = scalar_lea.hbm %s1092_s0, 2048  ;;  %p732_p10 = scmp.lt.s32.totalorder %s945_s24, %s1092_s0 }
  0x2b   : > { %p729_p2 = pnand %p728_p7, %p727_p5  ;;  %p733_p12 = scmp.lt.s32.totalorder %s731_s12, %s726_s30 }
  0x2d   : > { %p730_p9 = pneg %p729_p2  ;;  %p734_p13 = por %p733_p12, %p732_p10 }
  0x2f   : > { %p735_p0 = pnand %p734_p13, %p730_p9 }
  0x31   : > { %738 = shalt.err (!%p735_p0)
}
  0x32   : > { %s739_s11 = scalar_lea.vmem %s951_s26, 1024  ;;  %s827_s20 = smov [#allocation2]  }
  0x33   : > { %p740_p1 = scmp.ne.s32.totalorder %s951_s26, %s739_s11  ;;  %s744_s25 = sshll.u32 %s827_s20, 4  ;;  %s745_s25 = int_to_ptr.vmem [resolvable:$false] %s744_s25 }
  0x34   : > { %s746_s7 = scalar_lea.vmem %s745_s25, 2048  ;;  %p747_p2 = scmp.lt.s32.totalorder %s951_s26, %s745_s25 }
  0x35   : > { %p742_p6 = pnand %p740_p1, %p728_p7  ;;  %p748_p3 = scmp.lt.s32.totalorder %s746_s7, %s739_s11 }
  0x37   : > { %p743_p5 = pneg %p742_p6  ;;  %p749_p4 = por %p748_p3, %p747_p2 }
  0x39   : > { %p750_p8 = pnand %p749_p4, %p743_p5 }
  0x3b   : > { %753 = shalt.err (!%p750_p8)
}
  0x3c   : > { %648 = dma.hbm_to_vmem [thread:$0]  (!%p947_p11), %s945_s24, 1024, %s951_s26, %s953_s29, %s825_s5, %s825_s5, %s826_s6  }
  0x3d   : > { %p1108_p1 = scmp.ne.s32.totalorder %s1103_s23, 0 }
  0x3e   : > { %s980_s30 = sand.u32 (!%p1108_p1), 1, %s814_s16   ;;  %p1109_p4 = scmp.ne.s32.totalorder (!%p1108_p1), %s1101_s21, 0 }
  0x3f   : > { %196 = sbr.rel (%p1108_p1) target bundleno = 786 (0x312), region = 36  ;;  %s597_s8 = sshll.u32 (!%p1108_p1), %s980_s30, 6 }
  0x40   : > { %s199_s12 = scalar_lea.sflag (!%p1108_p1), [#allocation3], %s980_s30  ;;  %s202_s28 = scalar_lea.vmem (!%p1108_p1), [#allocation2], %s597_s8 }
  0x44   : > { %797 = dma.done.wait (%p1109_p4), %s199_s12, 1024  }
  0x45   : > { %799 = vsyncadd (%p1109_p4), %s199_s12, 4294966272  ;;  %p1110_p6 = scmp.eq.s32.totalorder %s879_s19, 0 }
  0x47   : > { %801 = dma.done.wait (%p1110_p6), [#allocation6], 1024   ;;  %p1111_p8 = pmov %p1110_p6 }
  0x48   : > { %v994_v0 = vld [vmem:[%s202_s28] sm:$0xff]  ;;  %v996_v1 = vld [vmem:[%s202_s28 + $0x8] sm:$0xff]  ;;  %v1004_v10 = vld [vmem:[%s202_s28 + $0x10] sm:$0xff]  ;;  %v828_v28 = vmov 0.0   ;;  %vm829_vm0 = vmmov 0   ;;  %v275_v33 = vlaneseq  ;;  %vm286_vm1 = vcmask 130112  }
  0x49   : > { %803 = vsyncadd (%p1111_p8), [#allocation6], 4294966272  ;;  %v239_v2 = vld [vmem:[#allocation5] sm:$0xff]  ;;  %v240_v3 = vld [vmem:[#allocation5 + $0x8] sm:$0xff]  ;;  %617 = vmatprep.subr.mxu0 %v828_v28  ;;  %628 = vmatprep.subr.mxu1 %v828_v28  ;;  %vm293_vm2 = vcmask 195712   ;;  %vm300_vm3 = vcmask 261312  }
  0x4a   : > { %v247_v4 = vmul.f32 %v239_v2, %v994_v0  ;;  %v999_v5 = vld [vmem:[%s202_s28 + $0x20] sm:$0xff]  ;;  %v1001_v6 = vld [vmem:[%s202_s28 + $0x28] sm:$0xff]  ;;  %v248_v7 = vmul.f32 %v240_v3, %v996_v1  ;;  %v1008_v13 = vld [vmem:[%s202_s28 + $0x18] sm:$0xff]  ;;  %625 = vmatprep.mubr.msk.f32.mxu0 %vm829_vm0, %v828_v28  ;;  %630 = vmatprep.mubr.msk.f32.mxu1 %vm829_vm0, %v828_v28  ;;  %v276_v34 = vand.u32 127, %v275_v33  ;;  %v278_v35 = vshrl.u32 %v275_v33, 7  ;;  %s230_s20 = scalar_lea.vmem [#allocation7], %s597_s8 }
  0x4b   : > { %v243_v8 = vld [vmem:[#allocation5 + $0x20] sm:$0xff]  ;;  %v244_v9 = vld [vmem:[#allocation5 + $0x28] sm:$0xff]  ;;  %v241_v14 = vld [vmem:[#allocation5 + $0x10] sm:$0xff]  ;;  %vm302_vm4 = vcmask 261120   ;;  %vm377_vm5 = vcmask 64512   ;;  %s506_s25 = sshll.u32 %s230_s20, 4  ;;  %s1042_s25 = int_to_ptr.vmem [resolvable:$true] %s506_s25 }
  0x4c   : > { %v251_v11 = vmul.f32 %v243_v8, %v999_v5  ;;  %v252_v12 = vmul.f32 %v244_v9, %v1001_v6  ;;  %v242_v15 = vld [vmem:[#allocation5 + $0x18] sm:$0xff]  ;;  %v255_v16 = vadd.f32 %v248_v7, %v247_v4  ;;  %v249_v17 = vmul.f32 %v241_v14, %v1004_v10  ;;  %v1012_v19 = vld [vmem:[%s202_s28 + $0x30] sm:$0xff]  ;;  %v268_v31 = vld [vmem:[%s1094_s2 + $0x8] sm:$0xff]  ;;  %s609_s7 = sshll.u32 %s879_s19, 10  ;;  %s493_s19 = scalar_lea.sflag [#allocation4], %s980_s30 }
  0x4d   : > { %v250_v18 = vmul.f32 %v242_v15, %v1008_v13  ;;  %v1014_v20 = vld [vmem:[%s202_s28 + $0x38] sm:$0xff]  ;;  %v245_v21 = vld [vmem:[#allocation5 + $0x30] sm:$0xff]  ;;  %v267_v32 = vld [vmem:[%s1094_s2] sm:$0xff]  ;;  %v281_v36 = vadd.s32 4294967288, %v276_v34  ;;  %v288_v37 = vadd.s32 4294967280, %v276_v34  ;;  %v295_v38 = vadd.s32 4294967272, %v276_v34  ;;  %s1047_s28 = scalar_lea.hbm %s1096_s4, %s609_s7 }
  0x4e   : > { %v261_v22 = vadd.f32 %v252_v12, %v251_v11  ;;  %v246_v23 = vld [vmem:[#allocation5 + $0x38] sm:$0xff]  ;;  %v253_v24 = vmul.f32 %v245_v21, %v1012_v19  ;;  %256 = vadd.xlane.f32.xlu0 %v255_v16  ;;  %v269_v30 = vld [vmem:[%s1094_s2 + $0x10] sm:$0xff]  ;;  %v279_v40 = vsub.s32 %v276_v34, %v278_v35  ;;  %v376_v54 = vld [vmem:[%s1095_s3] sm:$0xff]  ;;  %v459_v63 = vsub.s32 0, %v278_v35  ;;  %s754_s21 = scalar_lea.vmem %s1042_s25, 1024  ;;  %p1112_p11 = scmp.ne.s32.totalorder %s1106_s10, 0 }
  0x4f   : > { %v258_v25 = vadd.f32 %v250_v18, %v249_v17  ;;  %v254_v26 = vmul.f32 %v246_v23, %v1014_v20  ;;  %v270_v29 = vld [vmem:[%s1094_s2 + $0x18] sm:$0xff]  ;;  %v284_v42 = vsub.s32 %v281_v36, %v278_v35  ;;  %v291_v43 = vsub.s32 %v288_v37, %v278_v35  ;;  %629 = vmatpush3.msra.mxu1 %v376_v54  ;;  %p755_p3 = scmp.ne.s32.totalorder %s1042_s25, %s754_s21  ;;  %s830_s23 = smov [#allocation7]  }
  0x50   : > { %262 = vadd.xlane.f32.xlu1 %v261_v22  ;;  %618 = vmatpush3.msra.mxu0 %v270_v29  ;;  %v298_v44 = vsub.s32 %v295_v38, %v278_v35  ;;  %s758_s5 = sshll.u32 %s830_s23, 4  ;;  %s759_s5 = int_to_ptr.vmem [resolvable:$false] %s758_s5 }
  0x51   : > { %v264_v27 = vadd.f32 %v254_v26, %v253_v24  ;;  %619 = vmatprep.subr.mxu0 %v828_v28  ;;  %p756_p7 = pnand %p755_p3, %p1112_p11  ;;  %s760_s6 = scalar_lea.vmem %s759_s5, 2048 }
  0x52   : > { %259 = vadd.xlane.f32.xlu0 %v258_v25  ;;  %620 = vmatpush3.msra.mxu0 %v269_v30  ;;  %p761_p10 = scmp.lt.s32.totalorder %s1042_s25, %s759_s5  ;;  %p762_p12 = scmp.lt.s32.totalorder %s760_s6, %s754_s21 }
  0x53   : > { %621 = vmatprep.subr.mxu0 %v828_v28  ;;  %p757_p9 = pneg %p756_p7 }
  0x54   : > { %265 = vadd.xlane.f32.xlu1 %v264_v27  ;;  %622 = vmatpush3.msra.mxu0 %v268_v31  ;;  %p763_p13 = por %p762_p12, %p761_p10 }
  0x55   : > { %623 = vmatprep.subr.mxu0 %v828_v28 }
  0x56   : > { %624 = vmatpush3.msra.mxu0 %v267_v32  ;;  %p764_p0 = pnand %p763_p13, %p757_p9 }
  0xd7   : > { %v257_v39 = vpop.xlane.xlu0 %256 }
  0xd8   : > { %v280_v46 = vrot.slane %v257_v39, %v279_v40 }
  0xd9   : > { %v263_v41 = vpop.xlane.xlu1 %262 }
  0xda   : > { %v292_v49 = vrot.slane %v263_v41, %v291_v43 }
  0xdb   : > { %v260_v45 = vpop.xlane.xlu0 %259 }
  0xdc   : > { %v285_v47 = vrot.slane %v260_v45, %v284_v42 }
  0xdd   : > { %v266_v48 = vpop.xlane.xlu1 %265 }
  0xde   : > { %v299_v50 = vrot.slane %v266_v48, %v298_v44  ;;  %v287_v51 = vsel %vm286_vm1, %v285_v47, %v280_v46 }
  0xdf   : > { %v294_v52 = vsel %vm293_vm2, %v292_v49, %v287_v51 }
  0xe0   : > { %v301_v53 = vsel %vm300_vm3, %v299_v50, %v294_v52 }
  0xe1   : > { %626 = vmatmul.mubr.msk.f32.vlgmr.msra.gmra.mxu0 %vm302_vm4, %v301_v53 }
 0x1a1   : > { %v371_v55 = vpop.f32.mrf.mxu0 }
 0x1a2   : > { %v375_v56 = vmax.f32 %v371_v55, 0.0 }
 0x1a3   : > { %v627_v57 = vpop.f32.mrf.mxu0 }
 0x1a4   : > { %631 = vmatmul.mubr.msk.f32.vlgmr.msra.gmra.mxu1 %vm377_vm5, %v375_v56 }
 0x264   : > { %v447_v58 = vpop.f32.mrf.mxu1 }
 0x265   : > { %v602_v59 = vmul.f32 -1.442695, %v447_v58 }
 0x266   : > { %v632_v60 = vpop.f32.mrf.mxu1 }
 0x267   : > { %696 = vpow2.f32 %v602_v59 }
 0x274   : > { %v697_v61 = vpop.eup %696 }
 0x275   : > { %v454_v62 = vadd.f32 1.0, %v697_v61 }
 0x277   : > { %698 = vrcp.f32 %v454_v62 }
 0x284   : > { %v699_v2 = vpop.eup %698 }
 0x285   : > { %v460_v3 = vrot.slane %v699_v2, %v459_v63 }
 0x287   : > { %466 = vbcast.lane.b32.xlu1 %v460_v3, 264  ;;  %462 = vbcast.lane.b32.xlu0 %v460_v3, 256 }
 0x28b   : > { %470 = vbcast.lane.b32.xlu1 %v460_v3, 272 }
 0x28f   : > { %474 = vbcast.lane.b32.xlu1 %v460_v3, 280 }
 0x2f9   : > { %v467_v4 = vpop.permute.xlu1 %466  ;;  %v463_v7 = vpop.permute.xlu0 %462 }
 0x2fa   : > { %v478_v8 = vmul.f32 %v467_v4, %v1004_v10  ;;  %v479_v9 = vmul.f32 %v467_v4, %v1008_v13  ;;  %v476_v11 = vmul.f32 %v463_v7, %v994_v0  ;;  %v477_v12 = vmul.f32 %v463_v7, %v996_v1 }
 0x2fc   : > { %486 = vst [vmem:[%s230_s20 + $0x10] sm:$0xff] %v478_v8  ;;  %487 = vst [vmem:[%s230_s20 + $0x18] sm:$0xff] %v479_v9 }
 0x2fd   : > { %484 = vst [vmem:[%s230_s20] sm:$0xff] %v476_v11  ;;  %485 = vst [vmem:[%s230_s20 + $0x8] sm:$0xff] %v477_v12  ;;  %v471_v14 = vpop.permute.xlu1 %470 }
 0x2fe   : > { %v480_v15 = vmul.f32 %v471_v14, %v999_v5  ;;  %v481_v10 = vmul.f32 %v471_v14, %v1001_v6 }
 0x300   : > { %488 = vst [vmem:[%s230_s20 + $0x20] sm:$0xff] %v480_v15  ;;  %489 = vst [vmem:[%s230_s20 + $0x28] sm:$0xff] %v481_v10 }
 0x301   : > { %v475_v0 = vpop.permute.xlu1 %474 }
 0x302   : > { %v482_v1 = vmul.f32 %v475_v0, %v1012_v19  ;;  %v483_v5 = vmul.f32 %v475_v0, %v1014_v20 }
 0x304   : > { %490 = vst [vmem:[%s230_s20 + $0x30] sm:$0xff] %v482_v1  ;;  %491 = vst [vmem:[%s230_s20 + $0x38] sm:$0xff] %v483_v5 }
 0x305   : > { %767 = shalt.err (!%p764_p0)
}
 0x306   : > { %s768_s24 = scalar_lea.hbm %s1047_s28, 1024  ;;  %s772_s13 = scalar_lea.hbm %s1096_s4, 2048 }
 0x307   : > { %p769_p5 = scmp.ne.s32.totalorder %s1047_s28, %s768_s24  ;;  %p773_p4 = scmp.lt.s32.totalorder %s1047_s28, %s1096_s4 }
 0x308   : > { %p774_p6 = scmp.lt.s32.totalorder %s772_s13, %s768_s24 }
 0x309   : > { %p770_p2 = pnand %p769_p5, %p1112_p11 }
 0x30a   : > { %p775_p8 = por %p774_p6, %p773_p4 }
 0x30b   : > { %p771_p1 = pneg %p770_p2 }
 0x30d   : > { %p776_p3 = pnand %p775_p8, %p771_p1 }
 0x30f   : > { %779 = shalt.err (!%p776_p3)
}
 0x310   : > { %s831_s20 = smov 256   ;;  %s832_s7 = smov 16  }
 0x311   : > { %639 = dma.vmem_to_hbm [thread:$0]  (%p1112_p11), %s1042_s25, 1024, %s1047_s28, %s493_s19, %s831_s20, %s831_s20, %s832_s7  }
 0x312 PF: > { %s521_s8 = sand.u32 1, %s810_s15   ;;  %p1113_p7 = scmp.ne.s32.totalorder %s1102_s22, 0 }
 0x313   : > { %p1114_p9 = scmp.ge.s32.totalorder %s822_s18, 2  ;;  %s522_s12 = scalar_lea.sflag [#allocation4], %s521_s8 }
 0x315   : > { %p650_p10 = pnand %p1114_p9, %p1113_p7 }
 0x317   : > { %p651_p12 = pneg %p650_p10 }
 0x319   : > { %805 = dma.done.wait (%p651_p12), %s522_s12, 1024  }
 0x31a   : > { %807 = vsyncadd (%p651_p12), %s522_s12, 4294966272  ;;  %p18_p13 = scmp.ge.s32.totalorder %s912_s27, 4   ;;  %s1115_s15 = smov %s814_s16 }
 0x31b   : > { %s1116_s16 = smov %s818_s17  ;;  %s1117_s17 = smov %s932_s9 }
 0x31c   : > { %s1118_s18 = smov %s912_s27  ;;  %20 = sbr.rel (!%p18_p13) target bundleno = 6 (0x6), region = 85 }
 0x321   :  { %527 = vsyncpa [#allocation3], 1 }
 0x322   :  { %529 = vsyncpa [#allocation3 + $0x1], 1 }
 0x323   :  { %530 = vsyncpa [#allocation6], 1 }
 0x324   :  { %531 = vsyncpa [#allocation4], 1 }
 0x325   :  { %533 = vsyncpa [#allocation4 + $0x1], 1 }

</bundles_post_ra>
